<compile_context>
chip_gen: v7x
topology: tpu7x:2x2x1
jax: 0.10.0
libtpu: 0.0.40
codegen_flags: <defaults>
</compile_context>

<pallas_src>
import math

import jax
import jax.numpy as jnp
import numpy as np
from jax import lax
from jax.experimental import pallas as pl
from jax.experimental.pallas import tpu as pltpu


def _round_up(x, m):
    return ((x + m - 1) // m) * m


# ----------------------------- fused Pallas kernel -----------------------------

def _pattern_encoder_kernel(x_ref, a_ref, c_ref, pat_ref, o_ref):
    # x_ref  : (TM, D) streamed activation tile (natural layout, no transpose)
    # a_ref  : (K, D)  folded score operand  A = (Knet(pattern) @ Wq) / sqrt(D)
    # c_ref  : (1, K)  folded score bias     c = (Knet(pattern) @ bq) / sqrt(D)
    # pat_ref: (K, D)  raw pattern for the weighted sum
    x = x_ref[...]

    # scores = x @ A^T + c  -> (TM, K); contraction over D handled natively by the MXU.
    scores = lax.dot_general(
        x, a_ref[...],
        dimension_numbers=(((1,), (1,)), ((), ())),
        preferred_element_type=jnp.float32) + c_ref[...]

    # softmax over K (last axis)
    m = jnp.max(scores, axis=-1, keepdims=True)
    e = jnp.exp(scores - m)
    s = jnp.sum(e, axis=-1, keepdims=True)
    # exact reciprocal keeps the 1e-5 validation tolerance; approx=True would trade
    # a little accuracy for the (free) EUP slot on a kernel that is mem-bound anyway.
    w = e * pl.reciprocal(s, approx=False)                       # (TM, K)

    # weighted sum of the raw patterns: (TM, K) @ (K, D) -> (TM, D)
    out = jnp.dot(w, pat_ref[...], preferred_element_type=jnp.float32)
    o_ref[...] = out.astype(o_ref.dtype)


# ----------------------------- wrapper -----------------------------

def _choose_tile_m(M, cap=8192):
    """Tile over tokens: multiple of 8 (sublane), as large as sensible, capped so a
    double-buffered f32 in+out pair stays well under every generation's scoped VMEM."""
    m8 = _round_up(M, 8)
    return m8 if m8 <= cap else cap


def pattern_encoder_forward(X, pattern, wq, bq, wk, bk, *, tile_m=None):
    """X: (B, N, L, D); pattern: (K, D); wq/wk: (D, D) PyTorch Linear weights (out, in);
    bq/bk: (D,).  Returns (B, N, L, D)."""
    B, N, L, D = X.shape
    K, D2 = pattern.shape
    assert D == D2
    M = B * N * L

    # --- tiny grid-invariant precompute (f32, exact algebraic fold) ---
    inv_temp = 1.0 / math.sqrt(D)
    pat_k = (pattern.astype(jnp.float32) @ wk.astype(jnp.float32).T
             + bk.astype(jnp.float32))                              # Knet(pattern): (K, D)
    A = (pat_k @ wq.astype(jnp.float32)) * inv_temp                 # (K, D)
    c = (pat_k @ bq.astype(jnp.float32)).reshape(1, K) * inv_temp   # (1, K)

    if tile_m is None:
        tile_m = _choose_tile_m(M)
    assert tile_m % 8 == 0, "tile_m must be a multiple of 8 (sublane granularity)"
    n_tiles = -(-M // tile_m)
    M_pad = n_tiles * tile_m

    x2d = X.reshape(M, D)
    if M_pad != M:
        # zero rows softmax cleanly (scores == c) and are sliced off below
        x2d = jnp.pad(x2d, ((0, M_pad - M), (0, 0)))

    out2d = pl.pallas_call(
        _pattern_encoder_kernel,
        out_shape=jax.ShapeDtypeStruct((M_pad, D), X.dtype),
        grid=(n_tiles,),
        in_specs=[
            pl.BlockSpec((tile_m, D), lambda i: (i, 0)),   # streamed activation tile
            pl.BlockSpec((K, D), lambda i: (0, 0)),        # A        (VMEM-resident)
            pl.BlockSpec((1, K), lambda i: (0, 0)),        # c        (VMEM-resident)
            pl.BlockSpec((K, D), lambda i: (0, 0)),        # pattern  (VMEM-resident)
        ],
        out_specs=pl.BlockSpec((tile_m, D), lambda i: (i, 0)),
        compiler_params=pltpu.CompilerParams(
            dimension_semantics=("parallel",)),
    )(x2d, A, c, pattern)

    return out2d[:M].reshape(B, N, L, D)


# ----------------------------- reference (plain jnp) -----------------------------

def pattern_encoder_reference(X, pattern, wq, bq, wk, bk):
    K, D = pattern.shape
    pat_k = pattern @ wk.T + bk                                      # Knet
    qry = X @ wq.T + bq                                              # Qnet
    weight = jnp.einsum('kd,bnld->bnlk', pat_k, qry) / np.sqrt(D)
    weight = jax.nn.softmax(weight, axis=3)
    return jnp.einsum('bnlk,kd->bnld', weight, pattern)


# ----------------------------- main -----------------------------

if __name__ == "__main__":
    key = jax.random.PRNGKey(0)
    kp, kx, kwq, kbq, kwk, kbk = jax.random.split(key, 6)

    # Small shapes consistent with the module: X (B, N, L, D), pattern (K, D)
    B, N, L, D, K = 2, 16, 8, 32, 16

    pattern = jax.random.normal(kp, (K, D), dtype=jnp.float32)
    X = jax.random.normal(kx, (B, N, L, D), dtype=jnp.float32)

    # nn.Linear parameters in PyTorch layout: weight (out, in), bias (out,)
    wq = 0.1 * jax.random.normal(kwq, (D, D), dtype=jnp.float32)
    bq = 0.1 * jax.random.normal(kbq, (D,), dtype=jnp.float32)
    wk = 0.1 * jax.random.normal(kwk, (D, D), dtype=jnp.float32)
    bk = 0.1 * jax.random.normal(kbk, (D,), dtype=jnp.float32)
    # TODO(synk): self.qry_mat (nn.Embedding) exists in __init__ but is unused in forward().

    out = pattern_encoder_forward(X, pattern, wq, bq, wk, bk)
    out = jax.block_until_ready(out)

    ref = pattern_encoder_reference(X, pattern, wq, bq, wk, bk)
    ref = jax.block_until_ready(ref)

    assert out.shape == (B, N, L, D), out.shape
    np.testing.assert_allclose(np.asarray(out), np.asarray(ref), rtol=1e-5, atol=1e-5)

    print("KERNEL_OK")
</pallas_src>

<mosaic_0001>
module attributes {stable_mosaic.version = 11 : i64} {
  func.func @_pattern_encoder_kernel(%arg0: i32, %arg1: memref<256x32xf32, #tpu.memory_space<vmem>>, %arg2: memref<16x32xf32, #tpu.memory_space<vmem>>, %arg3: memref<1x16xf32, #tpu.memory_space<vmem>>, %arg4: memref<16x32xf32, #tpu.memory_space<vmem>>, %arg5: memref<256x32xf32, #tpu.memory_space<vmem>>) attributes {dimension_semantics = [#tpu.dimension_semantics<parallel>], iteration_bounds = array<i64: 1>, scalar_prefetch = 0 : i64, scratch_operands = 0 : i64, tpu.core_type = #tpu.core_type<tc>, window_params = [{transform_indices = @transform_0, window_bounds = array<i64: 256, 32>}, {pipeline_mode = #tpu.pipeline_mode<synchronous>, transform_indices = @transform_1, window_bounds = array<i64: 16, 32>}, {pipeline_mode = #tpu.pipeline_mode<synchronous>, transform_indices = @transform_2, window_bounds = array<i64: 1, 16>}, {pipeline_mode = #tpu.pipeline_mode<synchronous>, transform_indices = @transform_3, window_bounds = array<i64: 16, 32>}, {transform_indices = @transform_4, window_bounds = array<i64: 256, 32>}]} {
    %c0 = arith.constant 0 : index
    %c0_0 = arith.constant 0 : index
    %0 = vector.load %arg1[%c0, %c0_0] : memref<256x32xf32, #tpu.memory_space<vmem>>, vector<256x32xf32>
    %c0_1 = arith.constant 0 : index
    %c0_2 = arith.constant 0 : index
    %1 = vector.load %arg2[%c0_1, %c0_2] : memref<16x32xf32, #tpu.memory_space<vmem>>, vector<16x32xf32>
    %cst = arith.constant dense<0.000000e+00> : vector<256x16xf32>
    %2 = tpu.matmul %0, %1, %cst {dimension_numbers = #tpu.dot_dimension_numbers<[1], [1], [0], [0], [0, 0, 1, 0], [], []>} : vector<256x32xf32>, vector<16x32xf32>, vector<256x16xf32> -> vector<256x16xf32>
    %c0_3 = arith.constant 0 : index
    %c0_4 = arith.constant 0 : index
    %3 = vector.load %arg3[%c0_3, %c0_4] : memref<1x16xf32, #tpu.memory_space<vmem>>, vector<1x16xf32>
    %4 = vector.broadcast %3 : vector<1x16xf32> to vector<256x16xf32>
    %5 = arith.addf %2, %4 : vector<256x16xf32>
    %cst_5 = arith.constant dense<0xFF800000> : vector<256xf32>
    %6 = vector.multi_reduction <maximumf>, %5, %cst_5 [1] : vector<256x16xf32> to vector<256xf32>
    %7 = vector.shape_cast %6 : vector<256xf32> to vector<256x1xf32>
    %8 = vector.broadcast %7 : vector<256x1xf32> to vector<256x16xf32>
    %9 = arith.subf %5, %8 : vector<256x16xf32>
    %10 = math.exp %9 : vector<256x16xf32>
    %cst_6 = arith.constant dense<0.000000e+00> : vector<256xf32>
    %11 = vector.multi_reduction <add>, %10, %cst_6 [1] : vector<256x16xf32> to vector<256xf32>
    %12 = vector.shape_cast %11 : vector<256xf32> to vector<256x1xf32>
    %13 = tpu.reciprocal %12 : vector<256x1xf32> -> vector<256x1xf32>
    %14 = vector.broadcast %13 : vector<256x1xf32> to vector<256x16xf32>
    %15 = arith.mulf %10, %14 : vector<256x16xf32>
    %c0_7 = arith.constant 0 : index
    %c0_8 = arith.constant 0 : index
    %16 = vector.load %arg4[%c0_7, %c0_8] : memref<16x32xf32, #tpu.memory_space<vmem>>, vector<16x32xf32>
    %cst_9 = arith.constant dense<0.000000e+00> : vector<256x32xf32>
    %17 = tpu.matmul %15, %16, %cst_9 {dimension_numbers = #tpu.dot_dimension_numbers<[1], [0], [0], [1], [0, 0, 1, 1], [], []>} : vector<256x16xf32>, vector<16x32xf32>, vector<256x32xf32> -> vector<256x32xf32>
    %c0_10 = arith.constant 0 : index
    %c0_11 = arith.constant 0 : index
    %18 = vector.load %arg5[%c0_10, %c0_11] : memref<256x32xf32, #tpu.memory_space<vmem>>, vector<256x32xf32>
    tpu.vector_store %arg5[%c0_10, %c0_11], %17 {strides = array<i32>} : memref<256x32xf32, #tpu.memory_space<vmem>>, vector<256x32xf32>,
    return
  }
  func.func @transform_0(%arg0: i32) -> (i32, i32) {
    %c0_i32 = arith.constant 0 : i32
    %c0_i32_0 = arith.constant 0 : i32
    return %arg0, %c0_i32 : i32, i32
  }
  func.func @transform_1(%arg0: i32) -> (i32, i32) {
    %c0_i32 = arith.constant 0 : i32
    %c0_i32_0 = arith.constant 0 : i32
    %c0_i32_1 = arith.constant 0 : i32
    return %c0_i32, %c0_i32_0 : i32, i32
  }
  func.func @transform_2(%arg0: i32) -> (i32, i32) {
    %c0_i32 = arith.constant 0 : i32
    %c0_i32_0 = arith.constant 0 : i32
    %c0_i32_1 = arith.constant 0 : i32
    return %c0_i32, %c0_i32_0 : i32, i32
  }
  func.func @transform_3(%arg0: i32) -> (i32, i32) {
    %c0_i32 = arith.constant 0 : i32
    %c0_i32_0 = arith.constant 0 : i32
    %c0_i32_1 = arith.constant 0 : i32
    return %c0_i32, %c0_i32_0 : i32, i32
  }
  func.func @transform_4(%arg0: i32) -> (i32, i32) {
    %c0_i32 = arith.constant 0 : i32
    %c0_i32_0 = arith.constant 0 : i32
    return %arg0, %c0_i32 : i32, i32
  }
}

</mosaic_0001>

<bundles_post_ra>
// kernel: tpu_custom_call.1
= control target key start
LH: loop header
LB: loop body
LE: loop exit
PB: predicated region body
PF: predicated region fallthrough
CT: control target
= control target key end

     0   :  { %vm58_vm0 = vcmask 261120   ;;  %vm386_vm2 = vcmask 130048   ;;  %s2159_s1 = inlined_call_operand.vmem [shape: f32[16,32], index: 1, kind: input, shape index: {}]   ;;  %s2160_s0 = inlined_call_operand.vmem [shape: f32[256,32], index: 0, kind: input, shape index: {}]   ;;  %s2161_s2 = inlined_call_operand.vmem [shape: f32[1,16], index: 2, kind: input, shape index: {}]   ;;  %s2162_s3 = inlined_call_operand.vmem [shape: f32[16,32], index: 3, kind: input, shape index: {}]   ;;  %s2163_s4 = inlined_call_operand.vmem [shape: f32[256,32], index: 4, kind: output, shape index: {}]  }
   0x1   :  { %v49_v0 = vld [vmem:[%s2159_s1] sm:$0xff]  ;;  %v50_v1 = vld [vmem:[%s2159_s1 + $0x8] sm:$0xff]  ;;  %vm1338_vm1 = vmpackc.low %vm58_vm0, %vm58_vm0 }
   0x2   :  { %v1337_v2 = vpack.c.bf16 %v50_v1, %v49_v0  ;;  %v17_v3 = vld [vmem:[%s2160_s0] sm:$0xff]  ;;  %v18_v4 = vld [vmem:[%s2160_s0 + $0x8] sm:$0xff]  ;;  %v19_v5 = vld [vmem:[%s2160_s0 + $0x10] sm:$0xff] }
   0x3   :  { %1237 = vmatprep.mubr.msk.f32.mxu0 %vm58_vm0, %v17_v3  ;;  %v20_v6 = vld [vmem:[%s2160_s0 + $0x18] sm:$0xff]  ;;  %v21_v7 = vld [vmem:[%s2160_s0 + $0x20] sm:$0xff]  ;;  %v22_v8 = vld [vmem:[%s2160_s0 + $0x28] sm:$0xff] }
   0x4   :  { %1339 = vmatprep.subr.msk.bf16.mxu0 %vm1338_vm1, %v1337_v2  ;;  %v23_v9 = vld [vmem:[%s2160_s0 + $0x30] sm:$0xff]  ;;  %v24_v10 = vld [vmem:[%s2160_s0 + $0x38] sm:$0xff]  ;;  %v25_v11 = vld [vmem:[%s2160_s0 + $0x40] sm:$0xff] }
   0x5   :  { %1342 = vmatpush3.bf16.xpose.msk.msra.mxu0 %vm1338_vm1, %v1337_v2  ;;  %v26_v12 = vld [vmem:[%s2160_s0 + $0x48] sm:$0xff]  ;;  %v27_v13 = vld [vmem:[%s2160_s0 + $0x50] sm:$0xff]  ;;  %v28_v14 = vld [vmem:[%s2160_s0 + $0x58] sm:$0xff] }
   0x6   :  { %v29_v15 = vld [vmem:[%s2160_s0 + $0x60] sm:$0xff]  ;;  %v30_v16 = vld [vmem:[%s2160_s0 + $0x68] sm:$0xff]  ;;  %v31_v17 = vld [vmem:[%s2160_s0 + $0x70] sm:$0xff] }
   0x7   :  { %v32_v18 = vld [vmem:[%s2160_s0 + $0x78] sm:$0xff]  ;;  %v33_v19 = vld [vmem:[%s2160_s0 + $0x80] sm:$0xff]  ;;  %v34_v20 = vld [vmem:[%s2160_s0 + $0x88] sm:$0xff] }
   0x8   :  { %v35_v21 = vld [vmem:[%s2160_s0 + $0x90] sm:$0xff]  ;;  %v36_v22 = vld [vmem:[%s2160_s0 + $0x98] sm:$0xff]  ;;  %v37_v23 = vld [vmem:[%s2160_s0 + $0xa0] sm:$0xff] }
   0x9   :  { %v38_v24 = vld [vmem:[%s2160_s0 + $0xa8] sm:$0xff]  ;;  %v39_v25 = vld [vmem:[%s2160_s0 + $0xb0] sm:$0xff]  ;;  %v40_v26 = vld [vmem:[%s2160_s0 + $0xb8] sm:$0xff] }
   0xa   :  { %v41_v27 = vld [vmem:[%s2160_s0 + $0xc0] sm:$0xff]  ;;  %v42_v28 = vld [vmem:[%s2160_s0 + $0xc8] sm:$0xff]  ;;  %v43_v29 = vld [vmem:[%s2160_s0 + $0xd0] sm:$0xff] }
   0xb   :  { %v44_v30 = vld [vmem:[%s2160_s0 + $0xd8] sm:$0xff]  ;;  %v45_v31 = vld [vmem:[%s2160_s0 + $0xe0] sm:$0xff]  ;;  %v46_v32 = vld [vmem:[%s2160_s0 + $0xe8] sm:$0xff] }
   0xc   :  { %1238 = vmatmul.mubr.msk.f32.vlgmr.msra.gmra.mrb[0].mxu0 %vm58_vm0, %v18_v4  ;;  %v47_v33 = vld [vmem:[%s2160_s0 + $0xf0] sm:$0xff]  ;;  %v48_v34 = vld [vmem:[%s2160_s0 + $0xf8] sm:$0xff]  ;;  %v1639_v35 = vld [vmem:[%s2161_s2] ss:$0 sm:$0xff] }
   0xd   :  { %1240 = vmatprep.mubr.msk.f32.mxu0 %vm58_vm0, %v19_v5 }
  0x10   :  { %1241 = vmatmul.mubr.msk.f32.gmra.mrb[2].mxu0 %vm58_vm0, %v20_v6 }
  0x11   :  { %1243 = vmatprep.mubr.msk.f32.mxu0 %vm58_vm0, %v21_v7 }
  0x14   :  { %1244 = vmatmul.mubr.msk.f32.gmra.mrb[4].mxu0 %vm58_vm0, %v22_v8 }
  0x15   :  { %1246 = vmatprep.mubr.msk.f32.mxu0 %vm58_vm0, %v23_v9 }
  0x18   :  { %1247 = vmatmul.mubr.msk.f32.gmra.mrb[6].mxu0 %vm58_vm0, %v24_v10 }
  0x19   :  { %1249 = vmatprep.mubr.msk.f32.mxu0 %vm58_vm0, %v25_v11 }
  0x1c   :  { %1250 = vmatmul.mubr.msk.f32.gmra.mrb[8].mxu0 %vm58_vm0, %v26_v12 }
  0x1d   :  { %1252 = vmatprep.mubr.msk.f32.mxu0 %vm58_vm0, %v27_v13 }
  0x20   :  { %1253 = vmatmul.mubr.msk.f32.gmra.mrb[10].mxu0 %vm58_vm0, %v28_v14 }
  0x21   :  { %1255 = vmatprep.mubr.msk.f32.mxu0 %vm58_vm0, %v29_v15 }
  0x24   :  { %1256 = vmatmul.mubr.msk.f32.gmra.mrb[12].mxu0 %vm58_vm0, %v30_v16 }
  0x25   :  { %1258 = vmatprep.mubr.msk.f32.mxu0 %vm58_vm0, %v31_v17 }
  0x28   :  { %1259 = vmatmul.mubr.msk.f32.gmra.mrb[14].mxu0 %vm58_vm0, %v32_v18 }
  0x29   :  { %1261 = vmatprep.mubr.msk.f32.mxu0 %vm58_vm0, %v33_v19 }
  0x2c   :  { %1262 = vmatmul.mubr.msk.f32.gmra.mrb[16].mxu0 %vm58_vm0, %v34_v20 }
  0x2d   :  { %1264 = vmatprep.mubr.msk.f32.mxu0 %vm58_vm0, %v35_v21 }
  0x30   :  { %1265 = vmatmul.mubr.msk.f32.gmra.mrb[18].mxu0 %vm58_vm0, %v36_v22 }
  0x31   :  { %1267 = vmatprep.mubr.msk.f32.mxu0 %vm58_vm0, %v37_v23 }
  0x34   :  { %1268 = vmatmul.mubr.msk.f32.gmra.mrb[20].mxu0 %vm58_vm0, %v38_v24 }
  0x35   :  { %1270 = vmatprep.mubr.msk.f32.mxu0 %vm58_vm0, %v39_v25 }
  0x38   :  { %1271 = vmatmul.mubr.msk.f32.gmra.mrb[22].mxu0 %vm58_vm0, %v40_v26 }
  0x39   :  { %1273 = vmatprep.mubr.msk.f32.mxu0 %vm58_vm0, %v41_v27 }
  0x3c   :  { %1274 = vmatmul.mubr.msk.f32.gmra.mrb[24].mxu0 %vm58_vm0, %v42_v28 }
  0x3d   :  { %1276 = vmatprep.mubr.msk.f32.mxu0 %vm58_vm0, %v43_v29 }
  0x40   :  { %1277 = vmatmul.mubr.msk.f32.gmra.mrb[26].mxu0 %vm58_vm0, %v44_v30 }
  0x41   :  { %1279 = vmatprep.mubr.msk.f32.mxu0 %vm58_vm0, %v45_v31 }
  0x44   :  { %1280 = vmatmul.mubr.msk.f32.gmra.mrb[28].mxu0 %vm58_vm0, %v46_v32 }
  0x45   :  { %1282 = vmatprep.mubr.msk.f32.mxu0 %vm58_vm0, %v47_v33 }
  0x48   :  { %1283 = vmatmul.mubr.msk.f32.gmra.mrb[30].mxu0 %vm58_vm0, %v48_v34 }
  0xdf   :  { %v1239_v36 = vpop.f32.mrb[0].mxu0 }
  0xe0   :  { %v227_v37 = vpop.f32.mrb[1].mxu0  ;;  %v1645_v39 = vadd.f32 %v1239_v36, %v1639_v35 }
  0xe1   :  { %v1642_v38 = vadd.f32 %v1639_v35, %v227_v37 }
  0xe2   :  { %v390_v47 = vsel %vm386_vm2, %v1645_v39, -inf }
  0xe3   :  { %v1242_v40 = vpop.f32.mrb[2].mxu0  ;;  %v387_v41 = vsel %vm386_vm2, %v1642_v38, -inf }
  0xe4   :  { %v237_v42 = vpop.f32.mrb[3].mxu0  ;;  %388 = vmax.xlane.f32.xlu0 %v387_v41  ;;  %v1653_v44 = vadd.f32 %v1242_v40, %v1639_v35 }
  0xe5   :  { %v1650_v43 = vadd.f32 %v1639_v35, %v237_v42 }
  0xe6   :  { %v396_v52 = vsel %vm386_vm2, %v1653_v44, -inf }
  0xe7   :  { %v1245_v45 = vpop.f32.mrb[4].mxu0  ;;  %v393_v46 = vsel %vm386_vm2, %v1650_v43, -inf }
  0xe8   :  { %v247_v48 = vpop.f32.mrb[5].mxu0  ;;  %394 = vmax.xlane.f32.xlu1 %v393_v46  ;;  %391 = vmax.xlane.f32.xlu0 %v390_v47  ;;  %v1663_v50 = vadd.f32 %v1245_v45, %v1639_v35 }
  0xe9   :  { %v1660_v49 = vadd.f32 %v1639_v35, %v247_v48 }
  0xea   :  { %v402_v58 = vsel %vm386_vm2, %v1663_v50, -inf }
  0xeb   :  { %v1248_v51 = vpop.f32.mrb[6].mxu0  ;;  %v399_v53 = vsel %vm386_vm2, %v1660_v49, -inf }
  0xec   :  { %v257_v54 = vpop.f32.mrb[7].mxu0  ;;  %397 = vmax.xlane.f32.xlu1 %v396_v52  ;;  %400 = vmax.xlane.f32.xlu0 %v399_v53  ;;  %v1673_v56 = vadd.f32 %v1248_v51, %v1639_v35 }
  0xed   :  { %v1670_v55 = vadd.f32 %v1639_v35, %v257_v54 }
  0xee   :  { %v408_v0 = vsel %vm386_vm2, %v1673_v56, -inf }
  0xef   :  { %v1251_v57 = vpop.f32.mrb[8].mxu0  ;;  %v405_v59 = vsel %vm386_vm2, %v1670_v55, -inf }
  0xf0   :  { %v267_v60 = vpop.f32.mrb[9].mxu0  ;;  %403 = vmax.xlane.f32.xlu1 %v402_v58  ;;  %406 = vmax.xlane.f32.xlu0 %v405_v59  ;;  %v1683_v62 = vadd.f32 %v1251_v57, %v1639_v35 }
  0xf1   :  { %v1680_v61 = vadd.f32 %v1639_v35, %v267_v60 }
  0xf2   :  { %v414_v6 = vsel %vm386_vm2, %v1683_v62, -inf }
  0xf3   :  { %v1254_v63 = vpop.f32.mrb[10].mxu0  ;;  %v411_v1 = vsel %vm386_vm2, %v1680_v61, -inf }
  0xf4   :  { %v277_v2 = vpop.f32.mrb[11].mxu0  ;;  %409 = vmax.xlane.f32.xlu1 %v408_v0  ;;  %412 = vmax.xlane.f32.xlu0 %v411_v1  ;;  %v1693_v4 = vadd.f32 %v1254_v63, %v1639_v35 }
  0xf5   :  { %v1690_v3 = vadd.f32 %v1639_v35, %v277_v2 }
  0xf6   :  { %v420_v12 = vsel %vm386_vm2, %v1693_v4, -inf }
  0xf7   :  { %v1257_v5 = vpop.f32.mrb[12].mxu0  ;;  %v417_v7 = vsel %vm386_vm2, %v1690_v3, -inf }
  0xf8   :  { %v287_v8 = vpop.f32.mrb[13].mxu0  ;;  %415 = vmax.xlane.f32.xlu1 %v414_v6  ;;  %418 = vmax.xlane.f32.xlu0 %v417_v7  ;;  %v1703_v10 = vadd.f32 %v1257_v5, %v1639_v35 }
  0xf9   :  { %v1700_v9 = vadd.f32 %v1639_v35, %v287_v8 }
  0xfa   :  { %v426_v18 = vsel %vm386_vm2, %v1703_v10, -inf }
  0xfb   :  { %v1260_v11 = vpop.f32.mrb[14].mxu0  ;;  %v423_v13 = vsel %vm386_vm2, %v1700_v9, -inf }
  0xfc   :  { %v297_v14 = vpop.f32.mrb[15].mxu0  ;;  %421 = vmax.xlane.f32.xlu1 %v420_v12  ;;  %424 = vmax.xlane.f32.xlu0 %v423_v13  ;;  %v1713_v16 = vadd.f32 %v1260_v11, %v1639_v35 }
  0xfd   :  { %v1710_v15 = vadd.f32 %v1639_v35, %v297_v14 }
  0xfe   :  { %v432_v24 = vsel %vm386_vm2, %v1713_v16, -inf }
  0xff   :  { %v1263_v17 = vpop.f32.mrb[16].mxu0  ;;  %v429_v19 = vsel %vm386_vm2, %v1710_v15, -inf }
 0x100   :  { %v307_v20 = vpop.f32.mrb[17].mxu0  ;;  %427 = vmax.xlane.f32.xlu1 %v426_v18  ;;  %430 = vmax.xlane.f32.xlu0 %v429_v19  ;;  %v1723_v22 = vadd.f32 %v1263_v17, %v1639_v35 }
 0x101   :  { %v1720_v21 = vadd.f32 %v1639_v35, %v307_v20 }
 0x102   :  { %v438_v30 = vsel %vm386_vm2, %v1723_v22, -inf }
 0x103   :  { %v1266_v23 = vpop.f32.mrb[18].mxu0  ;;  %v435_v25 = vsel %vm386_vm2, %v1720_v21, -inf }
 0x104   :  { %v317_v26 = vpop.f32.mrb[19].mxu0  ;;  %433 = vmax.xlane.f32.xlu1 %v432_v24  ;;  %436 = vmax.xlane.f32.xlu0 %v435_v25  ;;  %v1733_v28 = vadd.f32 %v1266_v23, %v1639_v35 }
 0x105   :  { %v1730_v27 = vadd.f32 %v1639_v35, %v317_v26 }
 0x106   :  { %v444_v37 = vsel %vm386_vm2, %v1733_v28, -inf }
 0x107   :  { %v1269_v29 = vpop.f32.mrb[20].mxu0  ;;  %v441_v31 = vsel %vm386_vm2, %v1730_v27, -inf }
 0x108   :  { %v327_v32 = vpop.f32.mrb[21].mxu0  ;;  %439 = vmax.xlane.f32.xlu1 %v438_v30  ;;  %442 = vmax.xlane.f32.xlu0 %v441_v31  ;;  %v1743_v34 = vadd.f32 %v1269_v29, %v1639_v35 }
 0x109   :  { %v1740_v33 = vadd.f32 %v1639_v35, %v327_v32 }
 0x10a   :  { %v450_v47 = vsel %vm386_vm2, %v1743_v34, -inf }
 0x10b   :  { %v1272_v36 = vpop.f32.mrb[22].mxu0  ;;  %v447_v40 = vsel %vm386_vm2, %v1740_v33, -inf }
 0x10c   :  { %v337_v41 = vpop.f32.mrb[23].mxu0  ;;  %445 = vmax.xlane.f32.xlu1 %v444_v37  ;;  %448 = vmax.xlane.f32.xlu0 %v447_v40  ;;  %v1753_v45 = vadd.f32 %v1272_v36, %v1639_v35 }
 0x10d   :  { %v1750_v42 = vadd.f32 %v1639_v35, %v337_v41 }
 0x10e   :  { %v456_v57 = vsel %vm386_vm2, %v1753_v45, -inf }
 0x10f   :  { %v1275_v46 = vpop.f32.mrb[24].mxu0  ;;  %v453_v48 = vsel %vm386_vm2, %v1750_v42, -inf }
 0x110   :  { %v347_v51 = vpop.f32.mrb[25].mxu0  ;;  %451 = vmax.xlane.f32.xlu1 %v450_v47  ;;  %454 = vmax.xlane.f32.xlu0 %v453_v48  ;;  %v1763_v53 = vadd.f32 %v1275_v46, %v1639_v35 }
 0x111   :  { %v1760_v52 = vadd.f32 %v1639_v35, %v347_v51 }
 0x112   :  { %v462_v1 = vsel %vm386_vm2, %v1763_v53, -inf }
 0x113   :  { %v1278_v54 = vpop.f32.mrb[26].mxu0  ;;  %v459_v58 = vsel %vm386_vm2, %v1760_v52, -inf }
 0x114   :  { %v357_v59 = vpop.f32.mrb[27].mxu0  ;;  %457 = vmax.xlane.f32.xlu1 %v456_v57  ;;  %460 = vmax.xlane.f32.xlu0 %v459_v58  ;;  %v1773_v63 = vadd.f32 %v1278_v54, %v1639_v35 }
 0x115   :  { %v1770_v60 = vadd.f32 %v1639_v35, %v357_v59 }
 0x116   :  { %v468_v11 = vsel %vm386_vm2, %v1773_v63, -inf }
 0x117   :  { %v1281_v0 = vpop.f32.mrb[28].mxu0  ;;  %v465_v2 = vsel %vm386_vm2, %v1770_v60, -inf }
 0x118   :  { %v367_v5 = vpop.f32.mrb[29].mxu0  ;;  %463 = vmax.xlane.f32.xlu1 %v462_v1  ;;  %466 = vmax.xlane.f32.xlu0 %v465_v2  ;;  %v1783_v7 = vadd.f32 %v1281_v0, %v1639_v35 }
 0x119   :  { %v1780_v6 = vadd.f32 %v1639_v35, %v367_v5 }
 0x11a   :  { %v474_v18 = vsel %vm386_vm2, %v1783_v7, -inf }
 0x11b   :  { %v1284_v8 = vpop.f32.mrb[30].mxu0  ;;  %v471_v12 = vsel %vm386_vm2, %v1780_v6, -inf }
 0x11c   :  { %v1790_v13 = vadd.f32 %v1284_v8, %v1639_v35  ;;  %v377_v14 = vpop.f32.mrb[31].mxu0  ;;  %469 = vmax.xlane.f32.xlu1 %v468_v11  ;;  %472 = vmax.xlane.f32.xlu0 %v471_v12 }
 0x11d   :  { %v1793_v17 = vadd.f32 %v1639_v35, %v377_v14 }
 0x11e   :  { %v480_v20 = vsel %vm386_vm2, %v1790_v13, -inf }
 0x11f   :  { %v477_v19 = vsel %vm386_vm2, %v1793_v17, -inf }
 0x120   :  { %475 = vmax.xlane.f32.xlu1 %v474_v18  ;;  %478 = vmax.xlane.f32.xlu0 %v477_v19 }
 0x124   :  { %481 = vmax.xlane.f32.xlu1 %v480_v20 }
 0x171   :  { %v389_v23 = vpop.xlane.xlu0 %388 }
 0x172   :  { %v483_v24 = vsub.f32 %v1642_v38, %v389_v23 }
 0x174   :  { %v515_v25 = vmul.f32 1.442695, %v483_v24 }
 0x175   :  { %v395_v26 = vpop.xlane.xlu1 %394  ;;  %v392_v29 = vpop.xlane.xlu0 %391 }
 0x176   :  { %1347 = vpow2.f32 %v515_v25  ;;  %v485_v35 = vsub.f32 %v1650_v43, %v395_v26  ;;  %v484_v30 = vsub.f32 %v1645_v39, %v392_v29 }
 0x178   :  { %v519_v31 = vmul.f32 1.442695, %v485_v35  ;;  %v517_v32 = vmul.f32 1.442695, %v484_v30 }
 0x179   :  { %v398_v36 = vpop.xlane.xlu1 %397  ;;  %v401_v37 = vpop.xlane.xlu0 %400 }
 0x17a   :  { %1349 = vpow2.f32 %v519_v31  ;;  %v486_v40 = vsub.f32 %v1653_v44, %v398_v36  ;;  %v487_v41 = vsub.f32 %v1660_v49, %v401_v37 }
 0x17b   :  { %1351 = vpow2.f32 %v517_v32 }
 0x17c   :  { %v521_v46 = vmul.f32 1.442695, %v486_v40  ;;  %v523_v38 = vmul.f32 1.442695, %v487_v41 }
 0x17d   :  { %v404_v47 = vpop.xlane.xlu1 %403  ;;  %v407_v48 = vpop.xlane.xlu0 %406 }
 0x17e   :  { %1353 = vpow2.f32 %v521_v46  ;;  %v488_v51 = vsub.f32 %v1663_v50, %v404_v47  ;;  %v489_v43 = vsub.f32 %v1670_v55, %v407_v48 }
 0x17f   :  { %1355 = vpow2.f32 %v523_v38 }
 0x180   :  { %v1808_v39 = vpop.eup %1347  ;;  %v525_v54 = vmul.f32 1.442695, %v488_v51  ;;  %v527_v57 = vmul.f32 1.442695, %v489_v43 }
 0x181   :  { %v410_v58 = vpop.xlane.xlu1 %409  ;;  %v413_v59 = vpop.xlane.xlu0 %412  ;;  %v579_v44 = vsel %vm386_vm2, %v1808_v39, 0.0 }
 0x182   :  { %1357 = vpow2.f32 %v525_v54  ;;  %v490_v49 = vsub.f32 %v1673_v56, %v410_v58  ;;  %v491_v0 = vsub.f32 %v1680_v61, %v413_v59  ;;  %580 = vadd.xlane.f32.xlu0 %v579_v44 }
 0x183   :  { %1359 = vpow2.f32 %v527_v57 }
 0x184   :  { %v1814_v50 = vpop.eup %1349  ;;  %v529_v55 = vmul.f32 1.442695, %v490_v49  ;;  %v531_v1 = vmul.f32 1.442695, %v491_v0 }
 0x185   :  { %v1816_v2 = vpop.eup %1351  ;;  %v416_v5 = vpop.xlane.xlu1 %415  ;;  %v585_v11 = vsel %vm386_vm2, %v1814_v50, 0.0 }
 0x186   :  { %v419_v8 = vpop.xlane.xlu0 %418  ;;  %1361 = vpow2.f32 %v529_v55  ;;  %v492_v12 = vsub.f32 %v1683_v62, %v416_v5  ;;  %586 = vadd.xlane.f32.xlu0 %v585_v11  ;;  %v582_v61 = vsel %vm386_vm2, %v1816_v2, 0.0 }
 0x187   :  { %v493_v56 = vsub.f32 %v1690_v3, %v419_v8  ;;  %1363 = vpow2.f32 %v531_v1  ;;  %583 = vadd.xlane.f32.xlu1 %v582_v61 }
 0x188   :  { %v1824_v14 = vpop.eup %1353  ;;  %v533_v18 = vmul.f32 1.442695, %v492_v12 }
 0x189   :  { %v535_v19 = vmul.f32 1.442695, %v493_v56  ;;  %v1826_v20 = vpop.eup %1355  ;;  %v422_v23 = vpop.xlane.xlu1 %421  ;;  %v588_v25 = vsel %vm386_vm2, %v1824_v14, 0.0 }
 0x18a   :  { %v425_v24 = vpop.xlane.xlu0 %424  ;;  %1365 = vpow2.f32 %v533_v18  ;;  %v494_v62 = vsub.f32 %v1693_v4, %v422_v23  ;;  %v591_v26 = vsel %vm386_vm2, %v1826_v20, 0.0 }
 0x18b   :  { %v495_v3 = vsub.f32 %v1700_v9, %v425_v24  ;;  %1367 = vpow2.f32 %v535_v19  ;;  %589 = vadd.xlane.f32.xlu1 %v588_v25  ;;  %592 = vadd.xlane.f32.xlu0 %v591_v26 }
 0x18c   :  { %v1834_v29 = vpop.eup %1357  ;;  %v537_v35 = vmul.f32 1.442695, %v494_v62  ;;  %v739_v62 = vld [vmem:[%s2162_s3] sm:$0xff] }
 0x18d   :  { %v539_v30 = vmul.f32 1.442695, %v495_v3  ;;  %v1836_v31 = vpop.eup %1359  ;;  %v428_v32 = vpop.xlane.xlu1 %427  ;;  %v594_v37 = vsel %vm386_vm2, %v1834_v29, 0.0 }
 0x18e   :  { %v431_v36 = vpop.xlane.xlu0 %430  ;;  %1369 = vpow2.f32 %v537_v35  ;;  %v496_v4 = vsub.f32 %v1703_v10, %v428_v32  ;;  %v597_v40 = vsel %vm386_vm2, %v1836_v31, 0.0 }
 0x18f   :  { %v497_v9 = vsub.f32 %v1710_v15, %v431_v36  ;;  %1371 = vpow2.f32 %v539_v30  ;;  %595 = vadd.xlane.f32.xlu1 %v594_v37  ;;  %598 = vadd.xlane.f32.xlu0 %v597_v40 }
 0x190   :  { %v1844_v41 = vpop.eup %1361  ;;  %v541_v46 = vmul.f32 1.442695, %v496_v4 }
 0x191   :  { %v543_v38 = vmul.f32 1.442695, %v497_v9  ;;  %v1846_v47 = vpop.eup %1363  ;;  %v434_v48 = vpop.xlane.xlu1 %433  ;;  %v600_v43 = vsel %vm386_vm2, %v1844_v41, 0.0 }
 0x192   :  { %v437_v51 = vpop.xlane.xlu0 %436  ;;  %1373 = vpow2.f32 %v541_v46  ;;  %v498_v10 = vsub.f32 %v1713_v16, %v434_v48  ;;  %v603_v54 = vsel %vm386_vm2, %v1846_v47, 0.0 }
 0x193   :  { %v499_v15 = vsub.f32 %v1720_v21, %v437_v51  ;;  %1375 = vpow2.f32 %v543_v38  ;;  %601 = vadd.xlane.f32.xlu1 %v600_v43  ;;  %604 = vadd.xlane.f32.xlu0 %v603_v54 }
 0x194   :  { %v1854_v57 = vpop.eup %1365  ;;  %v545_v58 = vmul.f32 1.442695, %v498_v10 }
 0x195   :  { %v547_v59 = vmul.f32 1.442695, %v499_v15  ;;  %v1856_v44 = vpop.eup %1367  ;;  %v440_v49 = vpop.xlane.xlu1 %439  ;;  %v606_v55 = vsel %vm386_vm2, %v1854_v57, 0.0 }
 0x196   :  { %v443_v0 = vpop.xlane.xlu0 %442  ;;  %1377 = vpow2.f32 %v545_v58  ;;  %v500_v16 = vsub.f32 %v1723_v22, %v440_v49  ;;  %v609_v1 = vsel %vm386_vm2, %v1856_v44, 0.0 }
 0x197   :  { %v501_v21 = vsub.f32 %v1730_v27, %v443_v0  ;;  %1379 = vpow2.f32 %v547_v59  ;;  %607 = vadd.xlane.f32.xlu1 %v606_v55  ;;  %610 = vadd.xlane.f32.xlu0 %v609_v1 }
 0x198   :  { %v1864_v5 = vpop.eup %1369  ;;  %v549_v8 = vmul.f32 1.442695, %v500_v16 }
 0x199   :  { %v551_v11 = vmul.f32 1.442695, %v501_v21  ;;  %v1866_v12 = vpop.eup %1371  ;;  %v446_v56 = vpop.xlane.xlu1 %445  ;;  %v612_v18 = vsel %vm386_vm2, %v1864_v5, 0.0 }
 0x19a   :  { %v449_v61 = vpop.xlane.xlu0 %448  ;;  %1381 = vpow2.f32 %v549_v8  ;;  %v502_v22 = vsub.f32 %v1733_v28, %v446_v56  ;;  %v615_v19 = vsel %vm386_vm2, %v1866_v12, 0.0  ;;  %v740_v28 = vld [vmem:[%s2162_s3 + $0x8] sm:$0xff] }
 0x19b   :  { %v503_v27 = vsub.f32 %v1740_v33, %v449_v61  ;;  %1383 = vpow2.f32 %v551_v11  ;;  %613 = vadd.xlane.f32.xlu1 %v612_v18  ;;  %616 = vadd.xlane.f32.xlu0 %v615_v19  ;;  %v1343_v30 = vpack.c.bf16 %v740_v28, %v739_v62 }
 0x19c   :  { %v1874_v23 = vpop.eup %1373  ;;  %v553_v24 = vmul.f32 1.442695, %v502_v22 }
 0x19d   :  { %v555_v25 = vmul.f32 1.442695, %v503_v27  ;;  %v1882_v3 = vpop.eup %1375  ;;  %v452_v33 = vpop.xlane.xlu1 %451  ;;  %v618_v35 = vsel %vm386_vm2, %v1874_v23, 0.0  ;;  %1344 = vmatprep.subr.bf16.mxu1 %v1343_v30 }
 0x19e   :  { %v455_v26 = vpop.xlane.xlu0 %454  ;;  %1385 = vpow2.f32 %v553_v24  ;;  %v504_v32 = vsub.f32 %v1743_v34, %v452_v33  ;;  %v621_v37 = vsel %vm386_vm2, %v1882_v3, 0.0  ;;  %1346 = vmatpush3.bf16.msra.mxu1 %v1343_v30 }
 0x19f   :  { %v505_v36 = vsub.f32 %v1750_v42, %v455_v26  ;;  %1387 = vpow2.f32 %v555_v25  ;;  %619 = vadd.xlane.f32.xlu1 %v618_v35  ;;  %622 = vadd.xlane.f32.xlu0 %v621_v37 }
 0x1a0   :  { %v1890_v4 = vpop.eup %1377  ;;  %v557_v9 = vmul.f32 1.442695, %v504_v32 }
 0x1a1   :  { %v559_v40 = vmul.f32 1.442695, %v505_v36  ;;  %v1892_v46 = vpop.eup %1379  ;;  %v458_v38 = vpop.xlane.xlu1 %457  ;;  %v624_v34 = vsel %vm386_vm2, %v1890_v4, 0.0 }
 0x1a2   :  { %v461_v48 = vpop.xlane.xlu0 %460  ;;  %1389 = vpow2.f32 %v557_v9  ;;  %v506_v42 = vsub.f32 %v1753_v45, %v458_v38  ;;  %v627_v43 = vsel %vm386_vm2, %v1892_v46, 0.0 }
 0x1a3   :  { %v507_v51 = vsub.f32 %v1760_v52, %v461_v48  ;;  %1391 = vpow2.f32 %v559_v40  ;;  %625 = vadd.xlane.f32.xlu1 %v624_v34  ;;  %628 = vadd.xlane.f32.xlu0 %v627_v43 }
 0x1a4   :  { %v1900_v10 = vpop.eup %1381  ;;  %v561_v15 = vmul.f32 1.442695, %v506_v42 }
 0x1a5   :  { %v563_v54 = vmul.f32 1.442695, %v507_v51  ;;  %v1902_v58 = vpop.eup %1383  ;;  %v464_v59 = vpop.xlane.xlu1 %463  ;;  %v630_v0 = vsel %vm386_vm2, %v1900_v10, 0.0 }
 0x1a6   :  { %v467_v49 = vpop.xlane.xlu0 %466  ;;  %1393 = vpow2.f32 %v561_v15  ;;  %v508_v45 = vsub.f32 %v1763_v53, %v464_v59  ;;  %v633_v55 = vsel %vm386_vm2, %v1902_v58, 0.0 }
 0x1a7   :  { %v509_v52 = vsub.f32 %v1770_v60, %v467_v49  ;;  %1395 = vpow2.f32 %v563_v54  ;;  %631 = vadd.xlane.f32.xlu1 %v630_v0  ;;  %634 = vadd.xlane.f32.xlu0 %v633_v55 }
 0x1a8   :  { %v1910_v16 = vpop.eup %1385  ;;  %v565_v21 = vmul.f32 1.442695, %v508_v45 }
 0x1a9   :  { %v567_v1 = vmul.f32 1.442695, %v509_v52  ;;  %v1912_v8 = vpop.eup %1387  ;;  %v470_v11 = vpop.xlane.xlu1 %469  ;;  %v636_v61 = vsel %vm386_vm2, %v1910_v16, 0.0 }
 0x1aa   :  { %v473_v56 = vpop.xlane.xlu0 %472  ;;  %1397 = vpow2.f32 %v565_v21  ;;  %v510_v53 = vsub.f32 %v1773_v63, %v470_v11  ;;  %v639_v18 = vsel %vm386_vm2, %v1912_v8, 0.0 }
 0x1ab   :  { %v511_v60 = vsub.f32 %v1780_v6, %v473_v56  ;;  %1399 = vpow2.f32 %v567_v1  ;;  %637 = vadd.xlane.f32.xlu1 %v636_v61  ;;  %640 = vadd.xlane.f32.xlu0 %v639_v18 }
 0x1ac   :  { %v1920_v22 = vpop.eup %1389  ;;  %v569_v27 = vmul.f32 1.442695, %v510_v53 }
 0x1ad   :  { %v571_v19 = vmul.f32 1.442695, %v511_v60  ;;  %v1922_v24 = vpop.eup %1391  ;;  %v476_v25 = vpop.xlane.xlu1 %475  ;;  %v642_v28 = vsel %vm386_vm2, %v1920_v22, 0.0 }
 0x1ae   :  { %v479_v62 = vpop.xlane.xlu0 %478  ;;  %1401 = vpow2.f32 %v569_v27  ;;  %v512_v63 = vsub.f32 %v1783_v7, %v476_v25  ;;  %v645_v33 = vsel %vm386_vm2, %v1922_v24, 0.0 }
 0x1af   :  { %v513_v6 = vsub.f32 %v1793_v17, %v479_v62  ;;  %1403 = vpow2.f32 %v571_v19  ;;  %643 = vadd.xlane.f32.xlu1 %v642_v28  ;;  %646 = vadd.xlane.f32.xlu0 %v645_v33 }
 0x1b0   :  { %v1930_v26 = vpop.eup %1393  ;;  %v573_v35 = vmul.f32 1.442695, %v512_v63 }
 0x1b1   :  { %v575_v30 = vmul.f32 1.442695, %v513_v6  ;;  %v1932_v32 = vpop.eup %1395  ;;  %v482_v36 = vpop.xlane.xlu1 %481  ;;  %v648_v37 = vsel %vm386_vm2, %v1930_v26, 0.0 }
 0x1b2   :  { %1405 = vpow2.f32 %v573_v35  ;;  %v514_v7 = vsub.f32 %v1790_v13, %v482_v36  ;;  %v651_v17 = vsel %vm386_vm2, %v1932_v32, 0.0 }
 0x1b3   :  { %1407 = vpow2.f32 %v575_v30  ;;  %649 = vadd.xlane.f32.xlu1 %v648_v37  ;;  %652 = vadd.xlane.f32.xlu0 %v651_v17 }
 0x1b4   :  { %v1939_v9 = vpop.eup %1397  ;;  %v577_v40 = vmul.f32 1.442695, %v514_v7 }
 0x1b5   :  { %v1941_v38 = vpop.eup %1399  ;;  %v654_v48 = vsel %vm386_vm2, %v1939_v9, 0.0 }
 0x1b6   :  { %1409 = vpow2.f32 %v577_v40  ;;  %v657_v34 = vsel %vm386_vm2, %v1941_v38, 0.0 }
 0x1b7   :  { %655 = vadd.xlane.f32.xlu1 %v654_v48  ;;  %658 = vadd.xlane.f32.xlu0 %v657_v34 }
 0x1b8   :  { %v1947_v13 = vpop.eup %1401 }
 0x1b9   :  { %v1949_v42 = vpop.eup %1403  ;;  %v660_v51 = vsel %vm386_vm2, %v1947_v13, 0.0 }
 0x1ba   :  { %v663_v43 = vsel %vm386_vm2, %v1949_v42, 0.0 }
 0x1bb   :  { %661 = vadd.xlane.f32.xlu1 %v660_v51  ;;  %664 = vadd.xlane.f32.xlu0 %v663_v43 }
 0x1bc   :  { %v1955_v15 = vpop.eup %1405 }
 0x1bd   :  { %v1957_v54 = vpop.eup %1407  ;;  %v666_v59 = vsel %vm386_vm2, %v1955_v15, 0.0 }
 0x1be   :  { %v669_v49 = vsel %vm386_vm2, %v1957_v54, 0.0 }
 0x1bf   :  { %667 = vadd.xlane.f32.xlu1 %v666_v59  ;;  %670 = vadd.xlane.f32.xlu0 %v669_v49 }
 0x1c0   :  { %v1963_v0 = vpop.eup %1409 }
 0x1c1   :  { %v672_v45 = vsel %vm386_vm2, %v1963_v0, 0.0 }
 0x1c3   :  { %673 = vadd.xlane.f32.xlu1 %v672_v45 }
 0x20f   :  { %v581_v52 = vpop.xlane.xlu0 %580 }
 0x210   :  { %1411 = vrcp.f32 %v581_v52 }
 0x213   :  { %v587_v55 = vpop.xlane.xlu0 %586 }
 0x214   :  { %v584_v21 = vpop.xlane.xlu1 %583  ;;  %1413 = vrcp.f32 %v587_v55 }
 0x215   :  { %1415 = vrcp.f32 %v584_v21 }
 0x218   :  { %v590_v1 = vpop.xlane.xlu1 %589  ;;  %v593_v11 = vpop.xlane.xlu0 %592 }
 0x219   :  { %1417 = vrcp.f32 %v590_v1 }
 0x21a   :  { %v1412_v56 = vpop.eup %1411  ;;  %1419 = vrcp.f32 %v593_v11 }
 0x21b   :  { %v707_v61 = vmul.f32 %v1412_v56, %v1808_v39 }
 0x21c   :  { %v596_v53 = vpop.xlane.xlu1 %595  ;;  %v599_v60 = vpop.xlane.xlu0 %598 }
 0x21d   :  { %1421 = vrcp.f32 %v596_v53  ;;  %1289 = vmatprep.mubr.msk.f32.mxu1 %vm386_vm2, %v707_v61 }
 0x21e   :  { %v1414_v18 = vpop.eup %1413  ;;  %1423 = vrcp.f32 %v599_v60 }
 0x21f   :  { %v1416_v27 = vpop.eup %1415  ;;  %v709_v19 = vmul.f32 %v1414_v18, %v1814_v50 }
 0x220   :  { %v602_v25 = vpop.xlane.xlu1 %601  ;;  %v605_v62 = vpop.xlane.xlu0 %604  ;;  %v708_v28 = vmul.f32 %v1416_v27, %v1816_v2 }
 0x221   :  { %1425 = vrcp.f32 %v602_v25 }
 0x222   :  { %1427 = vrcp.f32 %v605_v62  ;;  %1290 = vmatmul.mubr.msk.f32.vlgmr.msra.gmra.mrb[0].mxu1 %vm386_vm2, %v708_v28 }
 0x223   :  { %v1418_v63 = vpop.eup %1417  ;;  %1292 = vmatprep.mubr.msk.f32.mxu1 %vm386_vm2, %v709_v19 }
 0x224   :  { %v1420_v39 = vpop.eup %1419  ;;  %v608_v6 = vpop.xlane.xlu1 %607  ;;  %v710_v35 = vmul.f32 %v1418_v63, %v1824_v14 }
 0x225   :  { %v611_v33 = vpop.xlane.xlu0 %610  ;;  %1429 = vrcp.f32 %v608_v6  ;;  %v711_v30 = vmul.f32 %v1420_v39, %v1826_v20 }
 0x226   :  { %1431 = vrcp.f32 %v611_v33  ;;  %1293 = vmatmul.mubr.msk.f32.gmra.mrb[2].mxu1 %vm386_vm2, %v710_v35 }
 0x227   :  { %v1422_v50 = vpop.eup %1421  ;;  %1295 = vmatprep.mubr.msk.f32.mxu1 %vm386_vm2, %v711_v30 }
 0x228   :  { %v1424_v2 = vpop.eup %1423  ;;  %v614_v36 = vpop.xlane.xlu1 %613  ;;  %v712_v7 = vmul.f32 %v1422_v50, %v1834_v29 }
 0x229   :  { %v617_v37 = vpop.xlane.xlu0 %616  ;;  %1433 = vrcp.f32 %v614_v36  ;;  %v713_v17 = vmul.f32 %v1424_v2, %v1836_v31 }
 0x22a   :  { %1435 = vrcp.f32 %v617_v37  ;;  %1296 = vmatmul.mubr.msk.f32.gmra.mrb[4].mxu1 %vm386_vm2, %v712_v7 }
 0x22b   :  { %v1426_v14 = vpop.eup %1425  ;;  %1298 = vmatprep.mubr.msk.f32.mxu1 %vm386_vm2, %v713_v17 }
 0x22c   :  { %v1428_v20 = vpop.eup %1427  ;;  %v620_v40 = vpop.xlane.xlu1 %619  ;;  %v714_v34 = vmul.f32 %v1426_v14, %v1844_v41 }
 0x22d   :  { %v623_v48 = vpop.xlane.xlu0 %622  ;;  %1437 = vrcp.f32 %v620_v40  ;;  %v715_v51 = vmul.f32 %v1428_v20, %v1846_v47 }
 0x22e   :  { %1439 = vrcp.f32 %v623_v48  ;;  %1299 = vmatmul.mubr.msk.f32.gmra.mrb[6].mxu1 %vm386_vm2, %v714_v34 }
 0x22f   :  { %v1430_v29 = vpop.eup %1429  ;;  %1301 = vmatprep.mubr.msk.f32.mxu1 %vm386_vm2, %v715_v51 }
 0x230   :  { %v1432_v31 = vpop.eup %1431  ;;  %v626_v43 = vpop.xlane.xlu1 %625  ;;  %v716_v49 = vmul.f32 %v1430_v29, %v1854_v57 }
 0x231   :  { %v629_v59 = vpop.xlane.xlu0 %628  ;;  %1441 = vrcp.f32 %v626_v43  ;;  %v717_v45 = vmul.f32 %v1432_v31, %v1856_v44 }
 0x232   :  { %1443 = vrcp.f32 %v629_v59  ;;  %1302 = vmatmul.mubr.msk.f32.gmra.mrb[8].mxu1 %vm386_vm2, %v716_v49 }
 0x233   :  { %v1434_v41 = vpop.eup %1433  ;;  %1304 = vmatprep.mubr.msk.f32.mxu1 %vm386_vm2, %v717_v45 }
 0x234   :  { %v1436_v47 = vpop.eup %1435  ;;  %v632_v52 = vpop.xlane.xlu1 %631  ;;  %v718_v21 = vmul.f32 %v1434_v41, %v1864_v5 }
 0x235   :  { %v635_v55 = vpop.xlane.xlu0 %634  ;;  %1445 = vrcp.f32 %v632_v52  ;;  %v719_v1 = vmul.f32 %v1436_v47, %v1866_v12 }
 0x236   :  { %1447 = vrcp.f32 %v635_v55  ;;  %1305 = vmatmul.mubr.msk.f32.gmra.mrb[10].mxu1 %vm386_vm2, %v718_v21 }
 0x237   :  { %v1438_v57 = vpop.eup %1437  ;;  %1307 = vmatprep.mubr.msk.f32.mxu1 %vm386_vm2, %v719_v1 }
 0x238   :  { %v1440_v44 = vpop.eup %1439  ;;  %v638_v11 = vpop.xlane.xlu1 %637  ;;  %v720_v61 = vmul.f32 %v1438_v57, %v1874_v23 }
 0x239   :  { %v641_v56 = vpop.xlane.xlu0 %640  ;;  %1449 = vrcp.f32 %v638_v11  ;;  %v721_v53 = vmul.f32 %v1440_v44, %v1882_v3 }
 0x23a   :  { %1451 = vrcp.f32 %v641_v56  ;;  %1308 = vmatmul.mubr.msk.f32.gmra.mrb[12].mxu1 %vm386_vm2, %v720_v61 }
 0x23b   :  { %v1442_v5 = vpop.eup %1441  ;;  %1310 = vmatprep.mubr.msk.f32.mxu1 %vm386_vm2, %v721_v53 }
 0x23c   :  { %v1444_v12 = vpop.eup %1443  ;;  %v644_v60 = vpop.xlane.xlu1 %643  ;;  %v722_v27 = vmul.f32 %v1442_v5, %v1890_v4 }
 0x23d   :  { %v647_v18 = vpop.xlane.xlu0 %646  ;;  %1453 = vrcp.f32 %v644_v60  ;;  %v723_v19 = vmul.f32 %v1444_v12, %v1892_v46 }
 0x23e   :  { %1455 = vrcp.f32 %v647_v18  ;;  %1311 = vmatmul.mubr.msk.f32.gmra.mrb[14].mxu1 %vm386_vm2, %v722_v27 }
 0x23f   :  { %v1446_v23 = vpop.eup %1445  ;;  %1313 = vmatprep.mubr.msk.f32.mxu1 %vm386_vm2, %v723_v19 }
 0x240   :  { %v1448_v3 = vpop.eup %1447  ;;  %v650_v25 = vpop.xlane.xlu1 %649  ;;  %v724_v28 = vmul.f32 %v1446_v23, %v1900_v10 }
 0x241   :  { %v653_v62 = vpop.xlane.xlu0 %652  ;;  %1457 = vrcp.f32 %v650_v25  ;;  %v725_v63 = vmul.f32 %v1448_v3, %v1902_v58 }
 0x242   :  { %1459 = vrcp.f32 %v653_v62  ;;  %1314 = vmatmul.mubr.msk.f32.gmra.mrb[16].mxu1 %vm386_vm2, %v724_v28 }
 0x243   :  { %v1450_v4 = vpop.eup %1449  ;;  %1316 = vmatprep.mubr.msk.f32.mxu1 %vm386_vm2, %v725_v63 }
 0x244   :  { %v1452_v46 = vpop.eup %1451  ;;  %v656_v39 = vpop.xlane.xlu1 %655  ;;  %v726_v33 = vmul.f32 %v1450_v4, %v1910_v16 }
 0x245   :  { %v659_v6 = vpop.xlane.xlu0 %658  ;;  %1461 = vrcp.f32 %v656_v39  ;;  %v727_v35 = vmul.f32 %v1452_v46, %v1912_v8 }
 0x246   :  { %1463 = vrcp.f32 %v659_v6  ;;  %1317 = vmatmul.mubr.msk.f32.gmra.mrb[18].mxu1 %vm386_vm2, %v726_v33 }
 0x247   :  { %v1454_v10 = vpop.eup %1453  ;;  %1319 = vmatprep.mubr.msk.f32.mxu1 %vm386_vm2, %v727_v35 }
 0x248   :  { %v1456_v58 = vpop.eup %1455  ;;  %v662_v30 = vpop.xlane.xlu1 %661  ;;  %v728_v2 = vmul.f32 %v1454_v10, %v1920_v22 }
 0x249   :  { %v665_v50 = vpop.xlane.xlu0 %664  ;;  %1465 = vrcp.f32 %v662_v30  ;;  %v729_v36 = vmul.f32 %v1456_v58, %v1922_v24 }
 0x24a   :  { %1467 = vrcp.f32 %v665_v50  ;;  %1320 = vmatmul.mubr.msk.f32.gmra.mrb[20].mxu1 %vm386_vm2, %v728_v2 }
 0x24b   :  { %v1458_v16 = vpop.eup %1457  ;;  %1322 = vmatprep.mubr.msk.f32.mxu1 %vm386_vm2, %v729_v36 }
 0x24c   :  { %v1460_v8 = vpop.eup %1459  ;;  %v668_v37 = vpop.xlane.xlu1 %667  ;;  %v730_v17 = vmul.f32 %v1458_v16, %v1930_v26 }
 0x24d   :  { %v671_v7 = vpop.xlane.xlu0 %670  ;;  %1469 = vrcp.f32 %v668_v37  ;;  %v731_v14 = vmul.f32 %v1460_v8, %v1932_v32 }
 0x24e   :  { %1471 = vrcp.f32 %v671_v7  ;;  %1323 = vmatmul.mubr.msk.f32.gmra.mrb[22].mxu1 %vm386_vm2, %v730_v17 }
 0x24f   :  { %v1462_v22 = vpop.eup %1461  ;;  %1325 = vmatprep.mubr.msk.f32.mxu1 %vm386_vm2, %v731_v14 }
 0x250   :  { %v1464_v24 = vpop.eup %1463  ;;  %v674_v20 = vpop.xlane.xlu1 %673  ;;  %v732_v40 = vmul.f32 %v1462_v22, %v1939_v9 }
 0x251   :  { %1473 = vrcp.f32 %v674_v20  ;;  %v733_v48 = vmul.f32 %v1464_v24, %v1941_v38 }
 0x252   :  { %1326 = vmatmul.mubr.msk.f32.gmra.mrb[24].mxu1 %vm386_vm2, %v732_v40 }
 0x253   :  { %v1466_v34 = vpop.eup %1465  ;;  %1328 = vmatprep.mubr.msk.f32.mxu1 %vm386_vm2, %v733_v48 }
 0x254   :  { %v1468_v26 = vpop.eup %1467  ;;  %v734_v32 = vmul.f32 %v1466_v34, %v1947_v13 }
 0x255   :  { %v735_v51 = vmul.f32 %v1468_v26, %v1949_v42 }
 0x256   :  { %1329 = vmatmul.mubr.msk.f32.gmra.mrb[26].mxu1 %vm386_vm2, %v734_v32 }
 0x257   :  { %v1470_v29 = vpop.eup %1469  ;;  %1331 = vmatprep.mubr.msk.f32.mxu1 %vm386_vm2, %v735_v51 }
 0x258   :  { %v1472_v31 = vpop.eup %1471  ;;  %v736_v9 = vmul.f32 %v1470_v29, %v1955_v15 }
 0x259   :  { %v737_v38 = vmul.f32 %v1472_v31, %v1957_v54 }
 0x25a   :  { %1332 = vmatmul.mubr.msk.f32.gmra.mrb[28].mxu1 %vm386_vm2, %v736_v9 }
 0x25b   :  { %v1474_v43 = vpop.eup %1473  ;;  %1334 = vmatprep.mubr.msk.f32.mxu1 %vm386_vm2, %v737_v38 }
 0x25c   :  { %v738_v59 = vmul.f32 %v1474_v43, %v1963_v0 }
 0x25e   :  { %1335 = vmatmul.mubr.msk.f32.gmra.mrb[30].mxu1 %vm386_vm2, %v738_v59 }
 0x2f5   :  { %v1291_v13 = vpop.f32.mrb[0].mxu1 }
 0x2f6   :  { %1063 = vst.msk [vmem:[%s2163_s4 + $0x8] sm:$0xff] %vm58_vm0, %v1291_v13  ;;  %v903_v42 = vpop.f32.mrb[1].mxu1 }
 0x2f7   :  { %1062 = vst.msk [vmem:[%s2163_s4] sm:$0xff] %vm58_vm0, %v903_v42 }
 0x2f9   :  { %v1294_v15 = vpop.f32.mrb[2].mxu1 }
 0x2fa   :  { %1065 = vst.msk [vmem:[%s2163_s4 + $0x18] sm:$0xff] %vm58_vm0, %v1294_v15  ;;  %v913_v54 = vpop.f32.mrb[3].mxu1 }
 0x2fb   :  { %1064 = vst.msk [vmem:[%s2163_s4 + $0x10] sm:$0xff] %vm58_vm0, %v913_v54 }
 0x2fd   :  { %v1297_v0 = vpop.f32.mrb[4].mxu1 }
 0x2fe   :  { %1067 = vst.msk [vmem:[%s2163_s4 + $0x28] sm:$0xff] %vm58_vm0, %v1297_v0  ;;  %v923_v49 = vpop.f32.mrb[5].mxu1 }
 0x2ff   :  { %1066 = vst.msk [vmem:[%s2163_s4 + $0x20] sm:$0xff] %vm58_vm0, %v923_v49 }
 0x301   :  { %v1300_v45 = vpop.f32.mrb[6].mxu1 }
 0x302   :  { %1069 = vst.msk [vmem:[%s2163_s4 + $0x38] sm:$0xff] %vm58_vm0, %v1300_v45  ;;  %v933_v41 = vpop.f32.mrb[7].mxu1 }
 0x303   :  { %1068 = vst.msk [vmem:[%s2163_s4 + $0x30] sm:$0xff] %vm58_vm0, %v933_v41 }
 0x305   :  { %v1303_v47 = vpop.f32.mrb[8].mxu1 }
 0x306   :  { %1071 = vst.msk [vmem:[%s2163_s4 + $0x48] sm:$0xff] %vm58_vm0, %v1303_v47  ;;  %v943_v52 = vpop.f32.mrb[9].mxu1 }
 0x307   :  { %1070 = vst.msk [vmem:[%s2163_s4 + $0x40] sm:$0xff] %vm58_vm0, %v943_v52 }
 0x309   :  { %v1306_v55 = vpop.f32.mrb[10].mxu1 }
 0x30a   :  { %1073 = vst.msk [vmem:[%s2163_s4 + $0x58] sm:$0xff] %vm58_vm0, %v1306_v55  ;;  %v953_v21 = vpop.f32.mrb[11].mxu1 }
 0x30b   :  { %1072 = vst.msk [vmem:[%s2163_s4 + $0x50] sm:$0xff] %vm58_vm0, %v953_v21 }
 0x30d   :  { %v1309_v1 = vpop.f32.mrb[12].mxu1 }
 0x30e   :  { %1075 = vst.msk [vmem:[%s2163_s4 + $0x68] sm:$0xff] %vm58_vm0, %v1309_v1  ;;  %v963_v57 = vpop.f32.mrb[13].mxu1 }
 0x30f   :  { %1074 = vst.msk [vmem:[%s2163_s4 + $0x60] sm:$0xff] %vm58_vm0, %v963_v57 }
 0x311   :  { %v1312_v44 = vpop.f32.mrb[14].mxu1 }
 0x312   :  { %1077 = vst.msk [vmem:[%s2163_s4 + $0x78] sm:$0xff] %vm58_vm0, %v1312_v44  ;;  %v973_v11 = vpop.f32.mrb[15].mxu1 }
 0x313   :  { %1076 = vst.msk [vmem:[%s2163_s4 + $0x70] sm:$0xff] %vm58_vm0, %v973_v11 }
 0x315   :  { %v1315_v56 = vpop.f32.mrb[16].mxu1 }
 0x316   :  { %1079 = vst.msk [vmem:[%s2163_s4 + $0x88] sm:$0xff] %vm58_vm0, %v1315_v56  ;;  %v983_v61 = vpop.f32.mrb[17].mxu1 }
 0x317   :  { %1078 = vst.msk [vmem:[%s2163_s4 + $0x80] sm:$0xff] %vm58_vm0, %v983_v61 }
 0x319   :  { %v1318_v53 = vpop.f32.mrb[18].mxu1 }
 0x31a   :  { %1081 = vst.msk [vmem:[%s2163_s4 + $0x98] sm:$0xff] %vm58_vm0, %v1318_v53  ;;  %v993_v5 = vpop.f32.mrb[19].mxu1 }
 0x31b   :  { %1080 = vst.msk [vmem:[%s2163_s4 + $0x90] sm:$0xff] %vm58_vm0, %v993_v5 }
 0x31d   :  { %v1321_v12 = vpop.f32.mrb[20].mxu1 }
 0x31e   :  { %1083 = vst.msk [vmem:[%s2163_s4 + $0xa8] sm:$0xff] %vm58_vm0, %v1321_v12  ;;  %v1003_v60 = vpop.f32.mrb[21].mxu1 }
 0x31f   :  { %1082 = vst.msk [vmem:[%s2163_s4 + $0xa0] sm:$0xff] %vm58_vm0, %v1003_v60 }
 0x321   :  { %v1324_v18 = vpop.f32.mrb[22].mxu1 }
 0x322   :  { %1085 = vst.msk [vmem:[%s2163_s4 + $0xb8] sm:$0xff] %vm58_vm0, %v1324_v18  ;;  %v1013_v27 = vpop.f32.mrb[23].mxu1 }
 0x323   :  { %1084 = vst.msk [vmem:[%s2163_s4 + $0xb0] sm:$0xff] %vm58_vm0, %v1013_v27 }
 0x325   :  { %v1327_v19 = vpop.f32.mrb[24].mxu1 }
 0x326   :  { %1087 = vst.msk [vmem:[%s2163_s4 + $0xc8] sm:$0xff] %vm58_vm0, %v1327_v19  ;;  %v1023_v23 = vpop.f32.mrb[25].mxu1 }
 0x327   :  { %1086 = vst.msk [vmem:[%s2163_s4 + $0xc0] sm:$0xff] %vm58_vm0, %v1023_v23 }
 0x329   :  { %v1330_v3 = vpop.f32.mrb[26].mxu1 }
 0x32a   :  { %1089 = vst.msk [vmem:[%s2163_s4 + $0xd8] sm:$0xff] %vm58_vm0, %v1330_v3  ;;  %v1033_v25 = vpop.f32.mrb[27].mxu1 }
 0x32b   :  { %1088 = vst.msk [vmem:[%s2163_s4 + $0xd0] sm:$0xff] %vm58_vm0, %v1033_v25 }
 0x32d   :  { %v1333_v62 = vpop.f32.mrb[28].mxu1 }
 0x32e   :  { %1091 = vst.msk [vmem:[%s2163_s4 + $0xe8] sm:$0xff] %vm58_vm0, %v1333_v62  ;;  %v1043_v28 = vpop.f32.mrb[29].mxu1 }
 0x32f   :  { %1090 = vst.msk [vmem:[%s2163_s4 + $0xe0] sm:$0xff] %vm58_vm0, %v1043_v28 }
 0x331   :  { %v1336_v63 = vpop.f32.mrb[30].mxu1 }
 0x332   :  { %1093 = vst.msk [vmem:[%s2163_s4 + $0xf8] sm:$0xff] %vm58_vm0, %v1336_v63  ;;  %v1053_v4 = vpop.f32.mrb[31].mxu1 }
 0x333   :  { %1092 = vst.msk [vmem:[%s2163_s4 + $0xf0] sm:$0xff] %vm58_vm0, %v1053_v4 }

</bundles_post_ra>
